<compile_context>
chip_gen: v5e
topology: v5e:2x2
jax: 0.10.0
libtpu: 0.0.40
codegen_flags: <defaults>
</compile_context>

<pallas_src>
import functools

import jax
import jax.numpy as jnp
from jax import lax
from jax.experimental import pallas as pl
from jax.experimental.pallas import tpu as pltpu


_SINGLE_TILE_MAX = 4096   # if the flat spatial span fits, use one static tile
_MULTI_TILE_TN = 1024     # otherwise tile the flat spatial dim in 1024-lane blocks


def _round_up(x, m):
    return ((x + m - 1) // m) * m


def _axis_coords(n, dtype=jnp.float32):
    """torch.linspace(-1, 1, n) equivalent."""
    if n == 1:
        return jnp.array([-1.0], dtype=dtype)
    return jnp.arange(n, dtype=dtype) * (2.0 / (n - 1)) - 1.0


def _coord_planes(height, width, dtype=jnp.float32):
    """channel_x: horizontal gradient along W; channel_y: vertical along H."""
    xs = _axis_coords(width, dtype)     # [W]
    ys = _axis_coords(height, dtype)    # [H]
    ch_x = jnp.broadcast_to(xs[None, :], (height, width))
    ch_y = jnp.broadcast_to(ys[:, None], (height, width))
    return ch_x, ch_y


@functools.partial(
    jax.jit, static_argnames=("kernel_size", "stride", "padding", "feed_dtype"))
def coord_conv_forward(x, weight, bias, *, kernel_size, stride, padding,
                       feed_dtype=jnp.bfloat16):
    """CoordConv forward.

    x: [B, Cin, H, W] float32; weight: [Cout, Cin+2, K, K]; bias: [Cout].
    Returns [B, Cout, OH, OW] float32 (NCHW).
    """
    B, Cin, H, W = x.shape
    Cout = weight.shape[0]
    KH = KW = kernel_size
    Hp, Wp = H + 2 * padding, W + 2 * padding
    OH = (Hp - KH) // stride + 1
    OW = (Wp - KW) // stride + 1

    # --- flat-index geometry ------------------------------------------------
    # Output pixel (oh, ow) is stored at flat lane position p = oh*(s*Wp)+ow*s,
    # so the input element needed for tap (kh, kw) sits at p + (kh*Wp + kw):
    # every tap is a constant lane shift of the same flat window.
    L_row = stride * Wp                      # flat stride between output rows
    N_span = OH * L_row                      # flat span we compute (incl. junk cols)
    d_max = (KH - 1) * Wp + (KW - 1)         # largest tap shift

    if N_span <= _SINGLE_TILE_MAX:
        TN = _round_up(N_span, 128)
        NT = 1
    else:
        TN = _MULTI_TILE_TN
        NT = pl.cdiv(N_span, TN)
    N_pad = NT * TN
    E = _round_up(d_max, 128) if d_max > 0 else 0
    WIN = TN + E                             # window read per grid step
    Lp = Hp * Wp
    Lpad = max(N_pad + E, Lp)                # every in-kernel read stays in bounds

    itemsize = jnp.dtype(feed_dtype).itemsize

    # --- wrapper-side layout (cheap XLA glue, sizes ~ the raw image) ---------
    xq = x.astype(feed_dtype)
    xp = jnp.pad(xq, ((0, 0), (0, 0), (padding, padding), (padding, padding)))
    x_flat = xp.reshape(B, Cin, Lp)
    x_flat = jnp.pad(x_flat, ((0, 0), (0, 0), (0, Lpad - Lp)))          # (B,Cin,Lpad)

    ch_x, ch_y = _coord_planes(H, W)                                     # (H,W) f32
    coords = jnp.stack([ch_x, ch_y], axis=0)                             # (2,H,W)
    coords = jnp.pad(coords, ((0, 0), (padding, padding), (padding, padding)))
    coords = coords.reshape(2, Lp)
    coords = jnp.pad(coords, ((0, 0), (0, Lpad - Lp))).astype(feed_dtype)  # (2,Lpad)

    # weight: (Cout, Cin+2, KH, KW) -> (KH*KW, Cout, Cin+2); split image/coord parts
    w_r = jnp.transpose(weight, (2, 3, 0, 1)).reshape(KH * KW, Cout, Cin + 2)
    w_r = w_r.astype(feed_dtype)
    w_img = w_r[:, :, :Cin]                                              # (KH*KW,Cout,Cin)
    w_crd = w_r[:, :, Cin:]                                              # (KH*KW,Cout,2)
    b2d = bias.reshape(Cout, 1).astype(jnp.float32)                      # (Cout,1)

    # --- Pallas kernel --------------------------------------------------------
    def kernel(x_ref, c_ref, wi_ref, wc_ref, b_ref, o_ref):
        if NT == 1:
            base = 0                                   # fully static path
        else:
            base = pl.multiple_of(pl.program_id(1) * TN, 128)
        xw = x_ref[0, :, pl.ds(base, WIN)]             # (Cin, WIN)  feed dtype
        cw = c_ref[:, pl.ds(base, WIN)]                # (2,   WIN)  feed dtype

        acc = jnp.zeros((Cout, TN), jnp.float32)       # f32 accumulate (MXU output)
        for kh in range(KH):
            for kw in range(KW):
                k = kh * KW + kw
                d = kh * Wp + kw                       # static lane shift per tap
                acc = acc + jnp.dot(wi_ref[k], xw[:, d:d + TN],
                                    preferred_element_type=jnp.float32)
                acc = acc + jnp.dot(wc_ref[k], cw[:, d:d + TN],
                                    preferred_element_type=jnp.float32)
        o_ref[0] = (acc + b_ref[...]).astype(o_ref.dtype)

    flops = 2 * B * OH * OW * Cout * (Cin + 2) * KH * KW
    bytes_accessed = (B * Cin * Lpad * itemsize            # image (read once / batch)
                      + 2 * Lpad * itemsize                # shared coord planes
                      + KH * KW * Cout * (Cin + 2) * itemsize
                      + Cout * 4
                      + B * Cout * N_pad * 4)              # f32 output

    out_flat = pl.pallas_call(
        kernel,
        out_shape=jax.ShapeDtypeStruct((B, Cout, N_pad), jnp.float32),
        grid_spec=pltpu.PrefetchScalarGridSpec(
            num_scalar_prefetch=0,
            grid=(B, NT),
            in_specs=[
                pl.BlockSpec((1, Cin, Lpad), lambda b, j: (b, 0, 0)),   # per-batch image
                pl.BlockSpec((2, Lpad), lambda b, j: (0, 0)),           # shared coords
                pl.BlockSpec((KH * KW, Cout, Cin), lambda b, j: (0, 0, 0)),
                pl.BlockSpec((KH * KW, Cout, 2), lambda b, j: (0, 0, 0)),
                pl.BlockSpec((Cout, 1), lambda b, j: (0, 0)),
            ],
            out_specs=pl.BlockSpec((1, Cout, TN), lambda b, j: (b, 0, j)),
        ),
        compiler_params=pltpu.CompilerParams(
            dimension_semantics=("parallel", "parallel"),
            vmem_limit_bytes=32 * 1024 * 1024,
        ),
        cost_estimate=pl.CostEstimate(
            flops=flops, transcendentals=0, bytes_accessed=bytes_accessed),
    )(x_flat, coords, w_img, w_crd, b2d)

    # (B, Cout, N_pad) -> NCHW: pure reshape + column slice, no transpose.
    y = out_flat[:, :, :N_span].reshape(B, Cout, OH, L_row)
    y = y[:, :, :, 0:(OW - 1) * stride + 1:stride]                      # (B,Cout,OH,OW)
    return y


def _reference_forward(x, weight, bias, *, kernel_size, stride, padding,
                       feed_dtype=jnp.bfloat16):
    """Pure-JAX reference (lax.conv) with the same bf16-rounded feeds."""
    B, _, H, W = x.shape
    ch_x, ch_y = _coord_planes(H, W)
    ch_x = jnp.broadcast_to(ch_x[None, None], (B, 1, H, W))
    ch_y = jnp.broadcast_to(ch_y[None, None], (B, 1, H, W))
    x_aug = jnp.concatenate([x, ch_x, ch_y], axis=1)
    x_aug = x_aug.astype(feed_dtype).astype(jnp.float32)
    w = weight.astype(feed_dtype).astype(jnp.float32)
    y = lax.conv_general_dilated(
        x_aug, w,
        window_strides=(stride, stride),
        padding=((padding, padding), (padding, padding)),
        dimension_numbers=("NCHW", "OIHW", "NCHW"),
        preferred_element_type=jnp.float32,
    )
    return y + bias.reshape(1, -1, 1, 1).astype(jnp.float32)


if __name__ == "__main__":
    # Small shapes consistent with the module (RGB-ish input).
    B, Cin, H, W = 2, 3, 16, 16
    Cout, ksize, stride, padding = 8, 3, 1, 1

    key = jax.random.PRNGKey(0)
    kx, kw_, kb = jax.random.split(key, 3)
    x = jax.random.normal(kx, (B, Cin, H, W), dtype=jnp.float32)
    # Conv operates on Cin + 2 channels (image + 2 coordinate channels).
    fan_in = (Cin + 2) * ksize * ksize
    bound = 1.0 / (fan_in ** 0.5)
    weight = jax.random.uniform(kw_, (Cout, Cin + 2, ksize, ksize),
                                minval=-bound, maxval=bound, dtype=jnp.float32)
    bias = jax.random.uniform(kb, (Cout,), minval=-bound, maxval=bound,
                              dtype=jnp.float32)

    out = coord_conv_forward(x, weight, bias,
                             kernel_size=ksize, stride=stride, padding=padding)
    out = jax.block_until_ready(out)

    ref = _reference_forward(x, weight, bias,
                             kernel_size=ksize, stride=stride, padding=padding)
    assert out.shape == ref.shape == (B, Cout, H, W)
    max_err = float(jnp.max(jnp.abs(out - ref)))
    assert jnp.allclose(out, ref, atol=5e-3, rtol=5e-3), (
        f"mismatch vs reference conv (max abs err {max_err})")

    print("KERNEL_OK")
</pallas_src>

<mosaic_0001>
module attributes {stable_mosaic.version = 11 : i64} {
  func.func @kernel(%arg0: i32, %arg1: i32, %arg2: memref<1x3x512xbf16, #tpu.memory_space<vmem>>, %arg3: memref<2x512xbf16, #tpu.memory_space<vmem>>, %arg4: memref<9x8x3xbf16, #tpu.memory_space<vmem>>, %arg5: memref<9x8x2xbf16, #tpu.memory_space<vmem>>, %arg6: memref<8x1xf32, #tpu.memory_space<vmem>>, %arg7: memref<1x8x384xf32, #tpu.memory_space<vmem>>) attributes {dimension_semantics = [#tpu.dimension_semantics<parallel>, #tpu.dimension_semantics<parallel>], iteration_bounds = array<i64: 2, 1>, scalar_prefetch = 0 : i64, scratch_operands = 0 : i64, tpu.core_type = #tpu.core_type<tc>, window_params = [{transform_indices = @transform_0, window_bounds = array<i64: 1, 3, 512>}, {pipeline_mode = #tpu.pipeline_mode<synchronous>, transform_indices = @transform_1, window_bounds = array<i64: 2, 512>}, {pipeline_mode = #tpu.pipeline_mode<synchronous>, transform_indices = @transform_2, window_bounds = array<i64: 9, 8, 3>}, {pipeline_mode = #tpu.pipeline_mode<synchronous>, transform_indices = @transform_3, window_bounds = array<i64: 9, 8, 2>}, {pipeline_mode = #tpu.pipeline_mode<synchronous>, transform_indices = @transform_4, window_bounds = array<i64: 8, 1>}, {transform_indices = @transform_5, window_bounds = array<i64: 1, 8, 384>}]} {
    %c0 = arith.constant 0 : index
    %c0_0 = arith.constant 0 : index
    %c0_1 = arith.constant 0 : index
    %0 = vector.load %arg2[%c0, %c0_0, %c0_1] : memref<1x3x512xbf16, #tpu.memory_space<vmem>>, vector<1x3x512xbf16>
    %1 = vector.shape_cast %0 : vector<1x3x512xbf16> to vector<3x512xbf16>
    %c0_2 = arith.constant 0 : index
    %c0_3 = arith.constant 0 : index
    %2 = vector.load %arg3[%c0_2, %c0_3] : memref<2x512xbf16, #tpu.memory_space<vmem>>, vector<2x512xbf16>
    %cst = arith.constant 0.000000e+00 : f32
    %3 = vector.broadcast %cst : f32 to vector<8x384xf32>
    %c0_4 = arith.constant 0 : index
    %c0_5 = arith.constant 0 : index
    %c0_6 = arith.constant 0 : index
    %4 = vector.load %arg4[%c0_4, %c0_5, %c0_6] : memref<9x8x3xbf16, #tpu.memory_space<vmem>>, vector<1x8x3xbf16>
    %5 = vector.shape_cast %4 : vector<1x8x3xbf16> to vector<8x3xbf16>
    %6 = vector.extract_strided_slice %1 {offsets = [0, 0], sizes = [3, 384], strides = [1, 1]} : vector<3x512xbf16> to vector<3x384xbf16>
    %cst_7 = arith.constant dense<0.000000e+00> : vector<8x384xf32>
    %7 = tpu.matmul %5, %6, %cst_7 {dimension_numbers = #tpu.dot_dimension_numbers<[1], [0], [0], [1], [0, 0, 1, 1], [], []>} : vector<8x3xbf16>, vector<3x384xbf16>, vector<8x384xf32> -> vector<8x384xf32>
    %8 = arith.addf %3, %7 : vector<8x384xf32>
    %c0_8 = arith.constant 0 : index
    %c0_9 = arith.constant 0 : index
    %c0_10 = arith.constant 0 : index
    %9 = vector.load %arg5[%c0_8, %c0_9, %c0_10] : memref<9x8x2xbf16, #tpu.memory_space<vmem>>, vector<1x8x2xbf16>
    %10 = vector.shape_cast %9 : vector<1x8x2xbf16> to vector<8x2xbf16>
    %11 = vector.extract_strided_slice %2 {offsets = [0, 0], sizes = [2, 384], strides = [1, 1]} : vector<2x512xbf16> to vector<2x384xbf16>
    %cst_11 = arith.constant dense<0.000000e+00> : vector<8x384xf32>
    %12 = tpu.matmul %10, %11, %cst_11 {dimension_numbers = #tpu.dot_dimension_numbers<[1], [0], [0], [1], [0, 0, 1, 1], [], []>} : vector<8x2xbf16>, vector<2x384xbf16>, vector<8x384xf32> -> vector<8x384xf32>
    %13 = arith.addf %8, %12 : vector<8x384xf32>
    %c1 = arith.constant 1 : index
    %c0_12 = arith.constant 0 : index
    %c0_13 = arith.constant 0 : index
    %14 = vector.load %arg4[%c1, %c0_12, %c0_13] : memref<9x8x3xbf16, #tpu.memory_space<vmem>>, vector<1x8x3xbf16>
    %15 = vector.shape_cast %14 : vector<1x8x3xbf16> to vector<8x3xbf16>
    %16 = vector.extract_strided_slice %1 {offsets = [0, 1], sizes = [3, 384], strides = [1, 1]} : vector<3x512xbf16> to vector<3x384xbf16>
    %cst_14 = arith.constant dense<0.000000e+00> : vector<8x384xf32>
    %17 = tpu.matmul %15, %16, %cst_14 {dimension_numbers = #tpu.dot_dimension_numbers<[1], [0], [0], [1], [0, 0, 1, 1], [], []>} : vector<8x3xbf16>, vector<3x384xbf16>, vector<8x384xf32> -> vector<8x384xf32>
    %18 = arith.addf %13, %17 : vector<8x384xf32>
    %c1_15 = arith.constant 1 : index
    %c0_16 = arith.constant 0 : index
    %c0_17 = arith.constant 0 : index
    %19 = vector.load %arg5[%c1_15, %c0_16, %c0_17] : memref<9x8x2xbf16, #tpu.memory_space<vmem>>, vector<1x8x2xbf16>
    %20 = vector.shape_cast %19 : vector<1x8x2xbf16> to vector<8x2xbf16>
    %21 = vector.extract_strided_slice %2 {offsets = [0, 1], sizes = [2, 384], strides = [1, 1]} : vector<2x512xbf16> to vector<2x384xbf16>
    %cst_18 = arith.constant dense<0.000000e+00> : vector<8x384xf32>
    %22 = tpu.matmul %20, %21, %cst_18 {dimension_numbers = #tpu.dot_dimension_numbers<[1], [0], [0], [1], [0, 0, 1, 1], [], []>} : vector<8x2xbf16>, vector<2x384xbf16>, vector<8x384xf32> -> vector<8x384xf32>
    %23 = arith.addf %18, %22 : vector<8x384xf32>
    %c2 = arith.constant 2 : index
    %c0_19 = arith.constant 0 : index
    %c0_20 = arith.constant 0 : index
    %24 = vector.load %arg4[%c2, %c0_19, %c0_20] : memref<9x8x3xbf16, #tpu.memory_space<vmem>>, vector<1x8x3xbf16>
    %25 = vector.shape_cast %24 : vector<1x8x3xbf16> to vector<8x3xbf16>
    %26 = vector.extract_strided_slice %1 {offsets = [0, 2], sizes = [3, 384], strides = [1, 1]} : vector<3x512xbf16> to vector<3x384xbf16>
    %cst_21 = arith.constant dense<0.000000e+00> : vector<8x384xf32>
    %27 = tpu.matmul %25, %26, %cst_21 {dimension_numbers = #tpu.dot_dimension_numbers<[1], [0], [0], [1], [0, 0, 1, 1], [], []>} : vector<8x3xbf16>, vector<3x384xbf16>, vector<8x384xf32> -> vector<8x384xf32>
    %28 = arith.addf %23, %27 : vector<8x384xf32>
    %c2_22 = arith.constant 2 : index
    %c0_23 = arith.constant 0 : index
    %c0_24 = arith.constant 0 : index
    %29 = vector.load %arg5[%c2_22, %c0_23, %c0_24] : memref<9x8x2xbf16, #tpu.memory_space<vmem>>, vector<1x8x2xbf16>
    %30 = vector.shape_cast %29 : vector<1x8x2xbf16> to vector<8x2xbf16>
    %31 = vector.extract_strided_slice %2 {offsets = [0, 2], sizes = [2, 384], strides = [1, 1]} : vector<2x512xbf16> to vector<2x384xbf16>
    %cst_25 = arith.constant dense<0.000000e+00> : vector<8x384xf32>
    %32 = tpu.matmul %30, %31, %cst_25 {dimension_numbers = #tpu.dot_dimension_numbers<[1], [0], [0], [1], [0, 0, 1, 1], [], []>} : vector<8x2xbf16>, vector<2x384xbf16>, vector<8x384xf32> -> vector<8x384xf32>
    %33 = arith.addf %28, %32 : vector<8x384xf32>
    %c3 = arith.constant 3 : index
    %c0_26 = arith.constant 0 : index
    %c0_27 = arith.constant 0 : index
    %34 = vector.load %arg4[%c3, %c0_26, %c0_27] : memref<9x8x3xbf16, #tpu.memory_space<vmem>>, vector<1x8x3xbf16>
    %35 = vector.shape_cast %34 : vector<1x8x3xbf16> to vector<8x3xbf16>
    %36 = vector.extract_strided_slice %1 {offsets = [0, 18], sizes = [3, 384], strides = [1, 1]} : vector<3x512xbf16> to vector<3x384xbf16>
    %cst_28 = arith.constant dense<0.000000e+00> : vector<8x384xf32>
    %37 = tpu.matmul %35, %36, %cst_28 {dimension_numbers = #tpu.dot_dimension_numbers<[1], [0], [0], [1], [0, 0, 1, 1], [], []>} : vector<8x3xbf16>, vector<3x384xbf16>, vector<8x384xf32> -> vector<8x384xf32>
    %38 = arith.addf %33, %37 : vector<8x384xf32>
    %c3_29 = arith.constant 3 : index
    %c0_30 = arith.constant 0 : index
    %c0_31 = arith.constant 0 : index
    %39 = vector.load %arg5[%c3_29, %c0_30, %c0_31] : memref<9x8x2xbf16, #tpu.memory_space<vmem>>, vector<1x8x2xbf16>
    %40 = vector.shape_cast %39 : vector<1x8x2xbf16> to vector<8x2xbf16>
    %41 = vector.extract_strided_slice %2 {offsets = [0, 18], sizes = [2, 384], strides = [1, 1]} : vector<2x512xbf16> to vector<2x384xbf16>
    %cst_32 = arith.constant dense<0.000000e+00> : vector<8x384xf32>
    %42 = tpu.matmul %40, %41, %cst_32 {dimension_numbers = #tpu.dot_dimension_numbers<[1], [0], [0], [1], [0, 0, 1, 1], [], []>} : vector<8x2xbf16>, vector<2x384xbf16>, vector<8x384xf32> -> vector<8x384xf32>
    %43 = arith.addf %38, %42 : vector<8x384xf32>
    %c4 = arith.constant 4 : index
    %c0_33 = arith.constant 0 : index
    %c0_34 = arith.constant 0 : index
    %44 = vector.load %arg4[%c4, %c0_33, %c0_34] : memref<9x8x3xbf16, #tpu.memory_space<vmem>>, vector<1x8x3xbf16>
    %45 = vector.shape_cast %44 : vector<1x8x3xbf16> to vector<8x3xbf16>
    %46 = vector.extract_strided_slice %1 {offsets = [0, 19], sizes = [3, 384], strides = [1, 1]} : vector<3x512xbf16> to vector<3x384xbf16>
    %cst_35 = arith.constant dense<0.000000e+00> : vector<8x384xf32>
    %47 = tpu.matmul %45, %46, %cst_35 {dimension_numbers = #tpu.dot_dimension_numbers<[1], [0], [0], [1], [0, 0, 1, 1], [], []>} : vector<8x3xbf16>, vector<3x384xbf16>, vector<8x384xf32> -> vector<8x384xf32>
    %48 = arith.addf %43, %47 : vector<8x384xf32>
    %c4_36 = arith.constant 4 : index
    %c0_37 = arith.constant 0 : index
    %c0_38 = arith.constant 0 : index
    %49 = vector.load %arg5[%c4_36, %c0_37, %c0_38] : memref<9x8x2xbf16, #tpu.memory_space<vmem>>, vector<1x8x2xbf16>
    %50 = vector.shape_cast %49 : vector<1x8x2xbf16> to vector<8x2xbf16>
    %51 = vector.extract_strided_slice %2 {offsets = [0, 19], sizes = [2, 384], strides = [1, 1]} : vector<2x512xbf16> to vector<2x384xbf16>
    %cst_39 = arith.constant dense<0.000000e+00> : vector<8x384xf32>
    %52 = tpu.matmul %50, %51, %cst_39 {dimension_numbers = #tpu.dot_dimension_numbers<[1], [0], [0], [1], [0, 0, 1, 1], [], []>} : vector<8x2xbf16>, vector<2x384xbf16>, vector<8x384xf32> -> vector<8x384xf32>
    %53 = arith.addf %48, %52 : vector<8x384xf32>
    %c5 = arith.constant 5 : index
    %c0_40 = arith.constant 0 : index
    %c0_41 = arith.constant 0 : index
    %54 = vector.load %arg4[%c5, %c0_40, %c0_41] : memref<9x8x3xbf16, #tpu.memory_space<vmem>>, vector<1x8x3xbf16>
    %55 = vector.shape_cast %54 : vector<1x8x3xbf16> to vector<8x3xbf16>
    %56 = vector.extract_strided_slice %1 {offsets = [0, 20], sizes = [3, 384], strides = [1, 1]} : vector<3x512xbf16> to vector<3x384xbf16>
    %cst_42 = arith.constant dense<0.000000e+00> : vector<8x384xf32>
    %57 = tpu.matmul %55, %56, %cst_42 {dimension_numbers = #tpu.dot_dimension_numbers<[1], [0], [0], [1], [0, 0, 1, 1], [], []>} : vector<8x3xbf16>, vector<3x384xbf16>, vector<8x384xf32> -> vector<8x384xf32>
    %58 = arith.addf %53, %57 : vector<8x384xf32>
    %c5_43 = arith.constant 5 : index
    %c0_44 = arith.constant 0 : index
    %c0_45 = arith.constant 0 : index
    %59 = vector.load %arg5[%c5_43, %c0_44, %c0_45] : memref<9x8x2xbf16, #tpu.memory_space<vmem>>, vector<1x8x2xbf16>
    %60 = vector.shape_cast %59 : vector<1x8x2xbf16> to vector<8x2xbf16>
    %61 = vector.extract_strided_slice %2 {offsets = [0, 20], sizes = [2, 384], strides = [1, 1]} : vector<2x512xbf16> to vector<2x384xbf16>
    %cst_46 = arith.constant dense<0.000000e+00> : vector<8x384xf32>
    %62 = tpu.matmul %60, %61, %cst_46 {dimension_numbers = #tpu.dot_dimension_numbers<[1], [0], [0], [1], [0, 0, 1, 1], [], []>} : vector<8x2xbf16>, vector<2x384xbf16>, vector<8x384xf32> -> vector<8x384xf32>
    %63 = arith.addf %58, %62 : vector<8x384xf32>
    %c6 = arith.constant 6 : index
    %c0_47 = arith.constant 0 : index
    %c0_48 = arith.constant 0 : index
    %64 = vector.load %arg4[%c6, %c0_47, %c0_48] : memref<9x8x3xbf16, #tpu.memory_space<vmem>>, vector<1x8x3xbf16>
    %65 = vector.shape_cast %64 : vector<1x8x3xbf16> to vector<8x3xbf16>
    %66 = vector.extract_strided_slice %1 {offsets = [0, 36], sizes = [3, 384], strides = [1, 1]} : vector<3x512xbf16> to vector<3x384xbf16>
    %cst_49 = arith.constant dense<0.000000e+00> : vector<8x384xf32>
    %67 = tpu.matmul %65, %66, %cst_49 {dimension_numbers = #tpu.dot_dimension_numbers<[1], [0], [0], [1], [0, 0, 1, 1], [], []>} : vector<8x3xbf16>, vector<3x384xbf16>, vector<8x384xf32> -> vector<8x384xf32>
    %68 = arith.addf %63, %67 : vector<8x384xf32>
    %c6_50 = arith.constant 6 : index
    %c0_51 = arith.constant 0 : index
    %c0_52 = arith.constant 0 : index
    %69 = vector.load %arg5[%c6_50, %c0_51, %c0_52] : memref<9x8x2xbf16, #tpu.memory_space<vmem>>, vector<1x8x2xbf16>
    %70 = vector.shape_cast %69 : vector<1x8x2xbf16> to vector<8x2xbf16>
    %71 = vector.extract_strided_slice %2 {offsets = [0, 36], sizes = [2, 384], strides = [1, 1]} : vector<2x512xbf16> to vector<2x384xbf16>
    %cst_53 = arith.constant dense<0.000000e+00> : vector<8x384xf32>
    %72 = tpu.matmul %70, %71, %cst_53 {dimension_numbers = #tpu.dot_dimension_numbers<[1], [0], [0], [1], [0, 0, 1, 1], [], []>} : vector<8x2xbf16>, vector<2x384xbf16>, vector<8x384xf32> -> vector<8x384xf32>
    %73 = arith.addf %68, %72 : vector<8x384xf32>
    %c7 = arith.constant 7 : index
    %c0_54 = arith.constant 0 : index
    %c0_55 = arith.constant 0 : index
    %74 = vector.load %arg4[%c7, %c0_54, %c0_55] : memref<9x8x3xbf16, #tpu.memory_space<vmem>>, vector<1x8x3xbf16>
    %75 = vector.shape_cast %74 : vector<1x8x3xbf16> to vector<8x3xbf16>
    %76 = vector.extract_strided_slice %1 {offsets = [0, 37], sizes = [3, 384], strides = [1, 1]} : vector<3x512xbf16> to vector<3x384xbf16>
    %cst_56 = arith.constant dense<0.000000e+00> : vector<8x384xf32>
    %77 = tpu.matmul %75, %76, %cst_56 {dimension_numbers = #tpu.dot_dimension_numbers<[1], [0], [0], [1], [0, 0, 1, 1], [], []>} : vector<8x3xbf16>, vector<3x384xbf16>, vector<8x384xf32> -> vector<8x384xf32>
    %78 = arith.addf %73, %77 : vector<8x384xf32>
    %c7_57 = arith.constant 7 : index
    %c0_58 = arith.constant 0 : index
    %c0_59 = arith.constant 0 : index
    %79 = vector.load %arg5[%c7_57, %c0_58, %c0_59] : memref<9x8x2xbf16, #tpu.memory_space<vmem>>, vector<1x8x2xbf16>
    %80 = vector.shape_cast %79 : vector<1x8x2xbf16> to vector<8x2xbf16>
    %81 = vector.extract_strided_slice %2 {offsets = [0, 37], sizes = [2, 384], strides = [1, 1]} : vector<2x512xbf16> to vector<2x384xbf16>
    %cst_60 = arith.constant dense<0.000000e+00> : vector<8x384xf32>
    %82 = tpu.matmul %80, %81, %cst_60 {dimension_numbers = #tpu.dot_dimension_numbers<[1], [0], [0], [1], [0, 0, 1, 1], [], []>} : vector<8x2xbf16>, vector<2x384xbf16>, vector<8x384xf32> -> vector<8x384xf32>
    %83 = arith.addf %78, %82 : vector<8x384xf32>
    %c8 = arith.constant 8 : index
    %c0_61 = arith.constant 0 : index
    %c0_62 = arith.constant 0 : index
    %84 = vector.load %arg4[%c8, %c0_61, %c0_62] : memref<9x8x3xbf16, #tpu.memory_space<vmem>>, vector<1x8x3xbf16>
    %85 = vector.shape_cast %84 : vector<1x8x3xbf16> to vector<8x3xbf16>
    %86 = vector.extract_strided_slice %1 {offsets = [0, 38], sizes = [3, 384], strides = [1, 1]} : vector<3x512xbf16> to vector<3x384xbf16>
    %cst_63 = arith.constant dense<0.000000e+00> : vector<8x384xf32>
    %87 = tpu.matmul %85, %86, %cst_63 {dimension_numbers = #tpu.dot_dimension_numbers<[1], [0], [0], [1], [0, 0, 1, 1], [], []>} : vector<8x3xbf16>, vector<3x384xbf16>, vector<8x384xf32> -> vector<8x384xf32>
    %88 = arith.addf %83, %87 : vector<8x384xf32>
    %c8_64 = arith.constant 8 : index
    %c0_65 = arith.constant 0 : index
    %c0_66 = arith.constant 0 : index
    %89 = vector.load %arg5[%c8_64, %c0_65, %c0_66] : memref<9x8x2xbf16, #tpu.memory_space<vmem>>, vector<1x8x2xbf16>
    %90 = vector.shape_cast %89 : vector<1x8x2xbf16> to vector<8x2xbf16>
    %91 = vector.extract_strided_slice %2 {offsets = [0, 38], sizes = [2, 384], strides = [1, 1]} : vector<2x512xbf16> to vector<2x384xbf16>
    %cst_67 = arith.constant dense<0.000000e+00> : vector<8x384xf32>
    %92 = tpu.matmul %90, %91, %cst_67 {dimension_numbers = #tpu.dot_dimension_numbers<[1], [0], [0], [1], [0, 0, 1, 1], [], []>} : vector<8x2xbf16>, vector<2x384xbf16>, vector<8x384xf32> -> vector<8x384xf32>
    %93 = arith.addf %88, %92 : vector<8x384xf32>
    %c0_68 = arith.constant 0 : index
    %c0_69 = arith.constant 0 : index
    %94 = vector.load %arg6[%c0_68, %c0_69] : memref<8x1xf32, #tpu.memory_space<vmem>>, vector<8x1xf32>
    %95 = vector.broadcast %94 : vector<8x1xf32> to vector<8x384xf32>
    %96 = arith.addf %93, %95 : vector<8x384xf32>
    %c0_70 = arith.constant 0 : index
    %c0_71 = arith.constant 0 : index
    %c0_72 = arith.constant 0 : index
    %97 = vector.load %arg7[%c0_70, %c0_71, %c0_72] : memref<1x8x384xf32, #tpu.memory_space<vmem>>, vector<1x8x384xf32>
    %98 = vector.shape_cast %97 : vector<1x8x384xf32> to vector<8x384xf32>
    %99 = vector.shape_cast %96 : vector<8x384xf32> to vector<1x8x384xf32>
    tpu.vector_store %arg7[%c0_70, %c0_71, %c0_72], %99 {strides = array<i32>} : memref<1x8x384xf32, #tpu.memory_space<vmem>>, vector<1x8x384xf32>,
    return
  }
  func.func @transform_0(%arg0: i32, %arg1: i32) -> (i32, i32, i32) {
    %c0_i32 = arith.constant 0 : i32
    %c0_i32_0 = arith.constant 0 : i32
    %c0_i32_1 = arith.constant 0 : i32
    return %arg0, %c0_i32, %c0_i32_0 : i32, i32, i32
  }
  func.func @transform_1(%arg0: i32, %arg1: i32) -> (i32, i32) {
    %c0_i32 = arith.constant 0 : i32
    %c0_i32_0 = arith.constant 0 : i32
    %c0_i32_1 = arith.constant 0 : i32
    return %c0_i32, %c0_i32_0 : i32, i32
  }
  func.func @transform_2(%arg0: i32, %arg1: i32) -> (i32, i32, i32) {
    %c0_i32 = arith.constant 0 : i32
    %c0_i32_0 = arith.constant 0 : i32
    %c0_i32_1 = arith.constant 0 : i32
    %c0_i32_2 = arith.constant 0 : i32
    return %c0_i32, %c0_i32_0, %c0_i32_1 : i32, i32, i32
  }
  func.func @transform_3(%arg0: i32, %arg1: i32) -> (i32, i32, i32) {
    %c0_i32 = arith.constant 0 : i32
    %c0_i32_0 = arith.constant 0 : i32
    %c0_i32_1 = arith.constant 0 : i32
    %c0_i32_2 = arith.constant 0 : i32
    return %c0_i32, %c0_i32_0, %c0_i32_1 : i32, i32, i32
  }
  func.func @transform_4(%arg0: i32, %arg1: i32) -> (i32, i32) {
    %c0_i32 = arith.constant 0 : i32
    %c0_i32_0 = arith.constant 0 : i32
    %c0_i32_1 = arith.constant 0 : i32
    return %c0_i32, %c0_i32_0 : i32, i32
  }
  func.func @transform_5(%arg0: i32, %arg1: i32) -> (i32, i32, i32) {
    %c0_i32 = arith.constant 0 : i32
    %c0_i32_0 = arith.constant 0 : i32
    return %arg0, %c0_i32, %arg1 : i32, i32, i32
  }
}

</mosaic_0001>

<bundles_post_ra>
// kernel: coord_conv_forward.1
= control target key start
LH: loop header
LB: loop body
LE: loop exit
PB: predicated region body
PF: predicated region fallthrough
CT: control target
= control target key end

     0   :  { %s1864_s18 = smov 0   ;;  %s1866_s19 = smov 0   ;;  %s2200_s0 = inlined_call_operand.vmem [shape: bf16[2,3,512], index: 0, kind: input, shape index: {}]   ;;  %s2201_s1 = inlined_call_operand.vmem [shape: bf16[2,512], index: 1, kind: input, shape index: {}]   ;;  %s2202_s2 = inlined_call_operand.vmem [shape: bf16[9,8,3], index: 2, kind: input, shape index: {}]   ;;  %s2203_s3 = inlined_call_operand.vmem [shape: bf16[9,8,2], index: 3, kind: input, shape index: {}]   ;;  %s2204_s4 = inlined_call_operand.vmem [shape: f32[8,1], index: 4, kind: input, shape index: {}]   ;;  %s2205_s5 = inlined_call_operand.vmem [shape: f32[2,8,384], index: 5, kind: output, shape index: {}]  }
   0x1   :  { %s1868_s20 = smov 0  }
   0x2 LB: > { %s27_s21 = sadd.s32 1, %s1818_s19  ;;  %p1686_p0 = scmp.ge.s32.totalorder %s1822_s20, 1  ;;  %s1822_s20 = sphi %s1868_s20, %s15_s20   ;;  %s1818_s19 = sphi %s1866_s19, %s2207_s19   ;;  %s1814_s18 = sphi %s1864_s18, %s2206_s18  }
   0x3   : > { %p29_p1 = scmp.ge.s32.totalorder %s27_s21, 2  ;;  %p201_p2 = scmp.lt.s32.totalorder %s1822_s20, 3 }
   0x5   : > { %s2209_s21 = smov (%p29_p1, %s27_s21), 0  ;;  %p202_p3 = pnand %p1686_p0, %p201_p2 }
   0x6   : > { %p233_p4 = scmp.lt.s32.totalorder (!%p202_p3), %s1814_s18, 1  ;;  %s1824_s28 = smov (!%p202_p3), 127  }
   0x7   : > { %205 = sbr.rel (%p202_p3) target bundleno = 484 (0x1e4), region = 40  ;;  %s1825_s29 = smov (!%p202_p3), 126  }
   0x8   : > { %s1826_s30 = smov (!%p202_p3), 110   ;;  %s1828_s8 = smov (!%p202_p3), 109  }
   0x9   : > { %s1829_s11 = smov (!%p202_p3), 108   ;;  %s1830_s12 = smov (!%p202_p3), 92  }
   0xa   : > { %s1831_s17 = smov (!%p202_p3), 91  }
   0xc   : > { %v1885_v0 = vld [vmem:[%s2201_s1] sm:$0xf]  ;;  %s2211_s18 = smov (!%p233_p4, %s1814_s18), 1  ;;  %vm262_vm0 = vcmask 1040384   ;;  %vm258_vm1 = vcmask 15360   ;;  %vm317_vm2 = vcmask 1041408  }
   0xd   : > { %254 = vst [vmem:[#allocation1] ss:$9 sm:$0xff] %v1885_v0  ;;  %s1762_s24 = sshll.u32 %s2211_s18, 3  ;;  %v252_v34 = vld [vmem:[%s2203_s3] sm:$0xf]  ;;  %v1827_v40 = vmov 65535  }
   0xe   : > { %s237_s27 = scalar_lea.vmem %s2200_s0, %s1762_s24  ;;  %v318_v41 = vsel %vm262_vm0, 4294967295, %v1827_v40  ;;  %v251_v49 = vld [vmem:[%s2202_s2] sm:$0xf]  ;;  %vm313_vm3 = vcmask 23552   ;;  %vm384_vm4 = vcmask 1039360   ;;  %vm537_vm5 = vcmask 1031168  }
   0xf   : > { %v1894_v1 = vld [vmem:[%s237_s27] sm:$0xff]  ;;  %v1930_v42 = vsel %vm317_vm2, %v318_v41, 0  ;;  %vm690_vm6 = vcmask 900096   ;;  %s1832_s24 = smov 90   ;;  %vm843_vm7 = vcmask 891904   ;;  %vm996_vm8 = vcmask 883712  }
  0x10   : > { %vm1149_vm9 = vcmask 752640   ;;  %vm1302_vm10 = vcmask 744448   ;;  %vm1455_vm11 = vcmask 736256   ;;  %s1763_s7 = smul.u32 24, %s2211_s18 }
  0x12   : > { %s246_s10 = scalar_lea.vmem %s2205_s5, %s1763_s7 }
  0x14   : > { %v255_v2 = vld [vmem:[#allocation1] sm:$0xff]  ;;  %v256_v3 = vld [vmem:[#allocation1 + $0x9] sm:$0xff]  ;;  %v1896_v4 = vld [vmem:[#allocation1 + $0x12] sm:$0xff] }
  0x15   : > { %309 = vst [vmem:[#allocation1] ss:$4 sm:$0xff] %v1894_v1  ;;  %v263_v32 = vsel %vm262_vm0, %v255_v2, 0  ;;  %v265_v33 = vsel %vm262_vm0, %v256_v3, 0  ;;  %v267_v39 = vsel %vm262_vm0, %v1896_v4, 0 }
  0x16   : > { %276 = vmatpush.bf16.msra.mxu0 %v263_v32  ;;  %289 = vmatpush.bf16.msra.mxu1 %v265_v33 }
  0x17   : > { %302 = vmatpush.bf16.msra.mxu2 %v267_v39 }
  0x19   : > { %1690 = vmatmul.msk.bf16.vlgmr.msra.gmra.mxu0 %vm258_vm1, %v252_v34  ;;  %1691 = vmatmul.msk.bf16.vlgmr.msra.gmra.mxu1 %vm258_vm1, %v252_v34 }
  0x1a   : > { %1692 = vmatmul.msk.bf16.vlgmr.msra.gmra.mxu2 %vm258_vm1, %v252_v34 }
  0x1c   : > { %v1899_v5 = vld.sshfl [vmem:[#allocation1] sm:$0xff pattern:$0x73625140]  ;;  %v1901_v6 = vld.sshfl [vmem:[#allocation1 + $0x8] sm:$0xff pattern:$0x73625140] }
  0x1d   : > { %v1903_v7 = vld.sshfl [vmem:[#allocation1 + $0x10] sm:$0xff pattern:$0x73625140]  ;;  %v320_v43 = vand.u32 %v1930_v42, %v1899_v5  ;;  %v322_v44 = vand.u32 %v1930_v42, %v1901_v6 }
  0x1e   : > { %367 = vst [vmem:[#allocation1] ss:$4 sm:$0xff] %v1894_v1  ;;  %v324_v54 = vand.u32 %v1930_v42, %v1903_v7 }
  0x1f   : > { %333 = vmatpush.bf16.msra.mxu3 %v320_v43  ;;  %346 = vmatpush.bf16.msrb.mxu0 %v322_v44 }
  0x20   : > { %359 = vmatpush.bf16.msrb.mxu1 %v324_v54 }
  0x22   : > { %1693 = vmatmul.msk.bf16.vlgmr.msra.gmra.mxu3 %vm313_vm3, %v251_v49 }
  0x25   : > { %v372_v8 = vld.sshfl [vmem:[#allocation1 + $0x10] sm:$0xff pattern:$0x73625140]  ;;  %v368_v9 = vld.sshfl [vmem:[#allocation1] sm:$0xff pattern:$0x73625140] }
  0x26   : > { %380 = vrot.lane.b32.xlu1 %v372_v8, %s1824_s28  ;;  %376 = vrot.lane.b32.xlu0 %v368_v9, %s1824_s28  ;;  %v374_v10 = vld.sshfl [vmem:[#allocation1 + $0x18] sm:$0xff pattern:$0x73625140]  ;;  %v370_v11 = vld.sshfl [vmem:[#allocation1 + $0x8] sm:$0xff pattern:$0x73625140] }
  0x27   : > { %444 = vst [vmem:[#allocation1] ss:$9 sm:$0xff] %v1885_v0 }
  0x29   : > { %1694 = vmatmul.msk.bf16.vlgmr.msrb.gmra.mxu0 %vm313_vm3, %v251_v49  ;;  %1695 = vmatmul.msk.bf16.vlgmr.msrb.gmra.mxu1 %vm313_vm3, %v251_v49 }
  0x2e   : > { %382 = vrot.lane.b32.xlu1 %v374_v10, %s1824_s28  ;;  %378 = vrot.lane.b32.xlu0 %v370_v11, %s1824_s28  ;;  %v449_v12 = vld [vmem:[#allocation1 + $0x12] sm:$0xff]  ;;  %v447_v13 = vld [vmem:[#allocation1 + $0x9] sm:$0xff]  ;;  %v451_v14 = vld [vmem:[#allocation1 + $0x1b] sm:$0xff] }
  0x2f   : > { %v445_v15 = vld [vmem:[#allocation1] sm:$0xff] }
  0x30   : > { %453 = vrot.lane.b32.xlu2 %v445_v15, %s1824_s28  ;;  %520 = vst [vmem:[#allocation1] ss:$4 sm:$0xff] %v1894_v1  ;;  %v1957_v10 = vld [vmem:[%s2203_s3 + $0x4] sm:$0xf] }
  0x36   : > { %457 = vrot.lane.b32.xlu0 %v449_v12, %s1824_s28  ;;  %459 = vrot.lane.b32.xlu1 %v451_v14, %s1824_s28 }
  0x37   : > { %v523_v16 = vld.sshfl [vmem:[#allocation1 + $0x8] sm:$0xff pattern:$0x73625140]  ;;  %v527_v17 = vld.sshfl [vmem:[#allocation1 + $0x18] sm:$0xff pattern:$0x73625140] }
  0x38   : > { %v521_v18 = vld.sshfl [vmem:[#allocation1] sm:$0xff pattern:$0x73625140]  ;;  %v525_v19 = vld.sshfl [vmem:[#allocation1 + $0x10] sm:$0xff pattern:$0x73625140]  ;;  %455 = vrot.lane.b32.xlu2 %v447_v13, %s1824_s28 }
  0x39   : > { %597 = vst [vmem:[#allocation1] ss:$9 sm:$0xff] %v1885_v0 }
  0x3e   : > { %531 = vrot.lane.b32.xlu0 %v523_v16, %s1825_s29  ;;  %533 = vrot.lane.b32.xlu1 %v525_v19, %s1825_s29 }
  0x40   : > { %v602_v20 = vld [vmem:[#allocation1 + $0x12] sm:$0xff]  ;;  %v600_v21 = vld [vmem:[#allocation1 + $0x9] sm:$0xff]  ;;  %529 = vrot.lane.b32.xlu2 %v521_v18, %s1825_s29  ;;  %v598_v22 = vld [vmem:[#allocation1] sm:$0xff] }
  0x41   : > { %v604_v23 = vld [vmem:[#allocation1 + $0x1b] sm:$0xff] }
  0x42   : > { %673 = vst [vmem:[#allocation1] ss:$4 sm:$0xff] %v1894_v1 }
  0x46   : > { %606 = vrot.lane.b32.xlu0 %v598_v22, %s1825_s29  ;;  %608 = vrot.lane.b32.xlu1 %v600_v21, %s1825_s29 }
  0x48   : > { %535 = vrot.lane.b32.xlu2 %v527_v17, %s1825_s29 }
  0x49   : > { %v676_v24 = vld.sshfl [vmem:[#allocation1 + $0x8] sm:$0xff pattern:$0x73625140]  ;;  %v674_v25 = vld.sshfl [vmem:[#allocation1] sm:$0xff pattern:$0x73625140] }
  0x4a   : > { %v678_v26 = vld.sshfl [vmem:[#allocation1 + $0x10] sm:$0xff pattern:$0x73625140]  ;;  %v680_v27 = vld.sshfl [vmem:[#allocation1 + $0x18] sm:$0xff pattern:$0x73625140] }
  0x4b   : > { %750 = vst [vmem:[#allocation1] ss:$9 sm:$0xff] %v1885_v0 }
  0x4e   : > { %612 = vrot.lane.b32.xlu0 %v604_v23, %s1825_s29  ;;  %682 = vrot.lane.b32.xlu1 %v674_v25, %s1826_s30 }
  0x50   : > { %610 = vrot.lane.b32.xlu2 %v602_v20, %s1825_s29 }
  0x52   : > { %v757_v28 = vld [vmem:[#allocation1 + $0x1b] sm:$0xff]  ;;  %v753_v30 = vld [vmem:[#allocation1 + $0x9] sm:$0xff]  ;;  %v755_v31 = vld [vmem:[#allocation1 + $0x12] sm:$0xff] }
  0x53   : > { %v751_v29 = vld [vmem:[#allocation1] sm:$0xff] }
  0x54   : > { %826 = vst [vmem:[#allocation1] ss:$4 sm:$0xff] %v1894_v1 }
  0x56   : > { %686 = vrot.lane.b32.xlu0 %v678_v26, %s1826_s30  ;;  %688 = vrot.lane.b32.xlu1 %v680_v27, %s1826_s30  ;;  %v1696_v26 = vld [vmem:[%s2202_s2 + $0x4] sm:$0xf] }
  0x58   : > { %684 = vrot.lane.b32.xlu2 %v676_v24, %s1826_s30 }
  0x5b   : > { %v831_v35 = vld.sshfl [vmem:[#allocation1 + $0x10] sm:$0xff pattern:$0x73625140]  ;;  %v827_v36 = vld.sshfl [vmem:[#allocation1] sm:$0xff pattern:$0x73625140] }
  0x5c   : > { %v829_v37 = vld.sshfl [vmem:[#allocation1 + $0x8] sm:$0xff pattern:$0x73625140]  ;;  %v833_v38 = vld.sshfl [vmem:[#allocation1 + $0x18] sm:$0xff pattern:$0x73625140] }
  0x5d   : > { %903 = vst [vmem:[#allocation1] ss:$9 sm:$0xff] %v1885_v0 }
  0x5e   : > { %761 = vrot.lane.b32.xlu0 %v753_v30, %s1826_s30  ;;  %763 = vrot.lane.b32.xlu1 %v755_v31, %s1826_s30 }
  0x60   : > { %759 = vrot.lane.b32.xlu2 %v751_v29, %s1826_s30 }
  0x64   : > { %v906_v45 = vld [vmem:[#allocation1 + $0x9] sm:$0xff]  ;;  %v908_v46 = vld [vmem:[#allocation1 + $0x12] sm:$0xff]  ;;  %v904_v47 = vld [vmem:[#allocation1] sm:$0xff] }
  0x65   : > { %v910_v48 = vld [vmem:[#allocation1 + $0x1b] sm:$0xff] }
  0x66   : > { %835 = vrot.lane.b32.xlu0 %v827_v36, %s1828_s8  ;;  %837 = vrot.lane.b32.xlu1 %v829_v37, %s1828_s8  ;;  %979 = vst [vmem:[#allocation1] ss:$4 sm:$0xff] %v1894_v1 }
  0x68   : > { %765 = vrot.lane.b32.xlu2 %v757_v28, %s1826_s30 }
  0x6d   : > { %v980_v50 = vld.sshfl [vmem:[#allocation1] sm:$0xff pattern:$0x73625140]  ;;  %v986_v51 = vld.sshfl [vmem:[#allocation1 + $0x18] sm:$0xff pattern:$0x73625140] }
  0x6e   : > { %841 = vrot.lane.b32.xlu0 %v833_v38, %s1828_s8  ;;  %912 = vrot.lane.b32.xlu1 %v904_v47, %s1828_s8  ;;  %v984_v52 = vld.sshfl [vmem:[#allocation1 + $0x10] sm:$0xff pattern:$0x73625140]  ;;  %v982_v53 = vld.sshfl [vmem:[#allocation1 + $0x8] sm:$0xff pattern:$0x73625140] }
  0x6f   : > { %1056 = vst [vmem:[#allocation1] ss:$9 sm:$0xff] %v1885_v0 }
  0x70   : > { %839 = vrot.lane.b32.xlu2 %v831_v35, %s1828_s8 }
  0x76   : > { %916 = vrot.lane.b32.xlu0 %v908_v46, %s1828_s8  ;;  %918 = vrot.lane.b32.xlu1 %v910_v48, %s1828_s8  ;;  %v1061_v55 = vld [vmem:[#allocation1 + $0x12] sm:$0xff]  ;;  %v1059_v56 = vld [vmem:[#allocation1 + $0x9] sm:$0xff]  ;;  %v1057_v57 = vld [vmem:[#allocation1] sm:$0xff] }
  0x77   : > { %v1063_v58 = vld [vmem:[#allocation1 + $0x1b] sm:$0xff] }
  0x78   : > { %914 = vrot.lane.b32.xlu2 %v906_v45, %s1828_s8  ;;  %1132 = vst [vmem:[#allocation1] ss:$4 sm:$0xff] %v1894_v1 }
  0x7e   : > { %992 = vrot.lane.b32.xlu1 %v984_v52, %s1829_s11  ;;  %990 = vrot.lane.b32.xlu0 %v982_v53, %s1829_s11 }
  0x7f   : > { %v1135_v59 = vld.sshfl [vmem:[#allocation1 + $0x8] sm:$0xff pattern:$0x73625140]  ;;  %v1133_v60 = vld.sshfl [vmem:[#allocation1] sm:$0xff pattern:$0x73625140] }
  0x80   : > { %988 = vrot.lane.b32.xlu2 %v980_v50, %s1829_s11  ;;  %v1137_v61 = vld.sshfl [vmem:[#allocation1 + $0x10] sm:$0xff pattern:$0x73625140]  ;;  %v1139_v62 = vld.sshfl [vmem:[#allocation1 + $0x18] sm:$0xff pattern:$0x73625140] }
  0x81   : > { %1209 = vst [vmem:[#allocation1] ss:$9 sm:$0xff] %v1885_v0 }
  0x86   : > { %1067 = vrot.lane.b32.xlu1 %v1059_v56, %s1829_s11  ;;  %1065 = vrot.lane.b32.xlu0 %v1057_v57, %s1829_s11 }
  0x88   : > { %994 = vrot.lane.b32.xlu2 %v986_v51, %s1829_s11  ;;  %v1210_v2 = vld [vmem:[#allocation1] sm:$0xff]  ;;  %v1212_v4 = vld [vmem:[#allocation1 + $0x9] sm:$0xff]  ;;  %v1214_v5 = vld [vmem:[#allocation1 + $0x12] sm:$0xff] }
  0x89   : > { %v1216_v3 = vld [vmem:[#allocation1 + $0x1b] sm:$0xff]  ;;  %v1704_v51 = vld [vmem:[%s2202_s2 + $0x8] sm:$0xf] }
  0x8a   : > { %v454_v63 = vpop.permute.xlu2 %453  ;;  %1285 = vst [vmem:[#allocation1] ss:$4 sm:$0xff] %v1894_v1 }
  0x8e   : > { %1071 = vrot.lane.b32.xlu0 %v1063_v58, %s1829_s11  ;;  %1141 = vrot.lane.b32.xlu1 %v1133_v60, %s1830_s12 }
  0x90   : > { %1069 = vrot.lane.b32.xlu2 %v1061_v55, %s1829_s11 }
  0x91   : > { %v1290_v9 = vld.sshfl [vmem:[#allocation1 + $0x10] sm:$0xff pattern:$0x73625140]  ;;  %v1286_v11 = vld.sshfl [vmem:[#allocation1] sm:$0xff pattern:$0x73625140] }
  0x92   : > { %v456_v6 = vpop.permute.xlu2 %455  ;;  %v1288_v12 = vld.sshfl [vmem:[#allocation1 + $0x8] sm:$0xff pattern:$0x73625140]  ;;  %v1292_v13 = vld.sshfl [vmem:[#allocation1 + $0x18] sm:$0xff pattern:$0x73625140] }
  0x93   : > { %v461_v7 = vsel %vm384_vm4, %v454_v63, %v456_v6  ;;  %1362 = vst [vmem:[#allocation1] ss:$9 sm:$0xff] %v1885_v0 }
  0x94   : > { %v468_v8 = vsel %vm262_vm0, %v461_v7, 0 }
  0x95   : > { %483 = vmatpush.bf16.msra.mxu1 %v468_v8 }
  0x96   : > { %1145 = vrot.lane.b32.xlu0 %v1137_v61, %s1830_s12  ;;  %1147 = vrot.lane.b32.xlu1 %v1139_v62, %s1830_s12 }
  0x98   : > { %v381_v14 = vpop.permute.xlu1 %380  ;;  %v377_v15 = vpop.permute.xlu0 %376  ;;  %1701 = vmatmul.msk.bf16.vlgmr.msra.gmra.mxu1 %vm258_vm1, %v1957_v10  ;;  %1143 = vrot.lane.b32.xlu2 %v1135_v59, %s1830_s12 }
  0x9a   : > { %v530_v16 = vpop.permute.xlu2 %529  ;;  %v1365_v27 = vld [vmem:[#allocation1 + $0x9] sm:$0xff]  ;;  %v1367_v28 = vld [vmem:[#allocation1 + $0x12] sm:$0xff]  ;;  %v1363_v29 = vld [vmem:[#allocation1] sm:$0xff] }
  0x9b   : > { %v1369_v30 = vld [vmem:[#allocation1 + $0x1b] sm:$0xff] }
  0x9c   : > { %1438 = vst [vmem:[#allocation1] ss:$4 sm:$0xff] %v1894_v1 }
  0x9e   : > { %1220 = vrot.lane.b32.xlu0 %v1212_v4, %s1830_s12  ;;  %1222 = vrot.lane.b32.xlu1 %v1214_v5, %s1830_s12  ;;  %v1708_v5 = vld [vmem:[%s2203_s3 + $0x8] sm:$0xf] }
  0xa0   : > { %v383_v17 = vpop.permute.xlu1 %382  ;;  %v379_v18 = vpop.permute.xlu0 %378  ;;  %1218 = vrot.lane.b32.xlu2 %v1210_v2, %s1830_s12 }
  0xa1   : > { %v387_v19 = vsel %vm384_vm4, %v381_v14, %v383_v17  ;;  %v385_v20 = vsel %vm384_vm4, %v377_v15, %v379_v18  ;;  %v386_v21 = vsel %vm384_vm4, %v379_v18, %v381_v14 }
  0xa2   : > { %v398_v22 = vand.u32 %v387_v19, %v1930_v42  ;;  %v392_v23 = vand.u32 %v385_v20, %v1930_v42  ;;  %v395_v24 = vand.u32 %v386_v21, %v1930_v42  ;;  %v536_v25 = vpop.permute.xlu2 %535 }
  0xa3   : > { %v1439_v1 = vld.sshfl [vmem:[#allocation1] sm:$0xff pattern:$0x73625140]  ;;  %v1445_v38 = vld.sshfl [vmem:[#allocation1 + $0x18] sm:$0xff pattern:$0x73625140] }
  0xa4   : > { %407 = vmatpush.bf16.msrb.mxu2 %v392_v23  ;;  %433 = vmatpush.bf16.msra.mxu0 %v398_v22  ;;  %v1441_v39 = vld.sshfl [vmem:[#allocation1 + $0x8] sm:$0xff pattern:$0x73625140]  ;;  %v1443_v40 = vld.sshfl [vmem:[#allocation1 + $0x10] sm:$0xff pattern:$0x73625140] }
  0xa5   : > { %420 = vmatpush.bf16.msrb.mxu3 %v395_v24  ;;  %1515 = vst [vmem:[#allocation1] ss:$9 sm:$0xff] %v1885_v0  ;;  %v1712_v23 = vld [vmem:[%s2202_s2 + $0xc] sm:$0xf] }
  0xa6   : > { %1294 = vrot.lane.b32.xlu0 %v1286_v11, %s1831_s17  ;;  %1296 = vrot.lane.b32.xlu1 %v1288_v12, %s1831_s17  ;;  %v1716_v24 = vld [vmem:[%s2203_s3 + $0xc] sm:$0xf] }
  0xa7   : > { %1697 = vmatmul.msk.bf16.vlgmr.msrb.gmra.mxu2 %vm313_vm3, %v1696_v26  ;;  %1699 = vmatmul.msk.bf16.vlgmr.msra.gmra.mxu0 %vm313_vm3, %v1696_v26 }
  0xa8   : > { %1698 = vmatmul.msk.bf16.vlgmr.msrb.gmra.mxu3 %vm313_vm3, %v1696_v26  ;;  %v458_v31 = vpop.permute.xlu0 %457  ;;  %v460_v32 = vpop.permute.xlu1 %459  ;;  %1224 = vrot.lane.b32.xlu2 %v1216_v3, %s1830_s12 }
  0xa9   : > { %v462_v33 = vsel %vm384_vm4, %v456_v6, %v458_v31  ;;  %v463_v34 = vsel %vm384_vm4, %v458_v31, %v460_v32 }
  0xaa   : > { %v471_v35 = vsel %vm262_vm0, %v462_v33, 0  ;;  %v474_v36 = vsel %vm262_vm0, %v463_v34, 0  ;;  %v611_v37 = vpop.permute.xlu2 %610 }
  0xab   : > { %496 = vmatpush.bf16.msra.mxu2 %v471_v35  ;;  %509 = vmatpush.bf16.msra.mxu3 %v474_v36 }
  0xac   : > { %v1518_v3 = vld [vmem:[#allocation1 + $0x9] sm:$0xff]  ;;  %v1516_v4 = vld [vmem:[#allocation1] sm:$0xff] }
  0xae   : > { %1300 = vrot.lane.b32.xlu0 %v1292_v13, %s1831_s17  ;;  %1371 = vrot.lane.b32.xlu1 %v1363_v29, %s1831_s17  ;;  %v1522_v13 = vld [vmem:[#allocation1 + $0x1b] sm:$0xff] }
  0xb0   : > { %v532_v41 = vpop.permute.xlu0 %531  ;;  %v534_v43 = vpop.permute.xlu1 %533  ;;  %1298 = vrot.lane.b32.xlu2 %v1290_v9, %s1831_s17 }
  0xb1   : > { %v538_v44 = vsel %vm537_vm5, %v530_v16, %v532_v41  ;;  %v539_v45 = vsel %vm537_vm5, %v532_v41, %v534_v43  ;;  %v540_v46 = vsel %vm537_vm5, %v534_v43, %v536_v25  ;;  %v1520_v25 = vld [vmem:[#allocation1 + $0x12] sm:$0xff]  ;;  %v291_v41 = vpop.f32.mrf.mxu1 }
  0xb2   : > { %v545_v47 = vand.u32 %v538_v44, %v1930_v42  ;;  %v548_v48 = vand.u32 %v539_v45, %v1930_v42  ;;  %v551_v49 = vand.u32 %v540_v46, %v1930_v42  ;;  %v685_v50 = vpop.permute.xlu2 %684  ;;  %v1720_v43 = vld [vmem:[%s2202_s2 + $0x10] sm:$0xf] }
  0xb4   : > { %560 = vmatpush.bf16.msrb.mxu0 %v545_v47  ;;  %573 = vmatpush.bf16.msrb.mxu1 %v548_v48 }
  0xb5   : > { %586 = vmatpush.bf16.msrb.mxu2 %v551_v49 }
  0xb6   : > { %1375 = vrot.lane.b32.xlu0 %v1367_v28, %s1831_s17  ;;  %1377 = vrot.lane.b32.xlu1 %v1369_v30, %s1831_s17  ;;  %v278_v30 = vpop.f32.mrf.mxu0 }
  0xb7   : > { %1702 = vmatmul.msk.bf16.vlgmr.msra.gmra.mxu2 %vm258_vm1, %v1957_v10  ;;  %1705 = vmatmul.msk.bf16.vlgmr.msrb.gmra.mxu0 %vm313_vm3, %v1704_v51 }
  0xb8   : > { %1703 = vmatmul.msk.bf16.vlgmr.msra.gmra.mxu3 %vm258_vm1, %v1957_v10  ;;  %v607_v0 = vpop.permute.xlu0 %606  ;;  %1706 = vmatmul.msk.bf16.vlgmr.msrb.gmra.mxu1 %vm313_vm3, %v1704_v51  ;;  %v609_v52 = vpop.permute.xlu1 %608 }
  0xb9   : > { %v614_v53 = vsel %vm537_vm5, %v607_v0, %v609_v52  ;;  %v615_v54 = vsel %vm537_vm5, %v609_v52, %v611_v37  ;;  %1373 = vrot.lane.b32.xlu2 %v1365_v27, %s1831_s17  ;;  %v335_v52 = vpop.f32.mrf.mxu3 }
  0xba   : > { %v621_v55 = vsel %vm262_vm0, %v614_v53, 0  ;;  %v624_v56 = vsel %vm262_vm0, %v615_v54, 0  ;;  %v760_v57 = vpop.permute.xlu2 %759  ;;  %v293_v53 = vpop.f32.mrf.mxu1  ;;  %v2074_v54 = vadd.f32 %v335_v52, %v278_v30 }
  0xbb   : > { %636 = vmatpush.bf16.msrb.mxu3 %v621_v55  ;;  %649 = vmatpush.bf16.msra.mxu0 %v624_v56 }
  0xbe   : > { %1449 = vrot.lane.b32.xlu0 %v1441_v39, %s1832_s24  ;;  %1451 = vrot.lane.b32.xlu1 %v1443_v40, %s1832_s24 }
  0xc0   : > { %v613_v58 = vpop.permute.xlu0 %612  ;;  %v683_v59 = vpop.permute.xlu1 %682 }
  0xc1   : > { %v616_v60 = vsel %vm537_vm5, %v611_v37, %v613_v58  ;;  %v691_v61 = vsel %vm690_vm6, %v683_v59, %v685_v50  ;;  %1447 = vrot.lane.b32.xlu2 %v1439_v1, %s1832_s24  ;;  %v280_v1 = vpop.f32.mrf.mxu0 }
  0xc2   : > { %v627_v62 = vsel %vm262_vm0, %v616_v60, 0  ;;  %v698_v63 = vand.u32 %v691_v61, %v1930_v42  ;;  %v766_v2 = vpop.permute.xlu2 %765 }
  0xc3   : > { %662 = vmatpush.bf16.msra.mxu1 %v627_v62 }
  0xc4   : > { %713 = vmatpush.bf16.msra.mxu2 %v698_v63 }
  0xc6   : > { %1526 = vrot.lane.b32.xlu1 %v1518_v3, %s1832_s24  ;;  %1524 = vrot.lane.b32.xlu0 %v1516_v4, %s1832_s24  ;;  %v337_v3 = vpop.f32.mrf.mxu3  ;;  %v304_v4 = vpop.f32.mrf.mxu2 }
  0xc7   : > { %1707 = vmatmul.msk.bf16.vlgmr.msrb.gmra.mxu2 %vm313_vm3, %v1704_v51  ;;  %1710 = vmatmul.msk.bf16.vlgmr.msra.gmra.mxu0 %vm258_vm1, %v1708_v5 }
  0xc8   : > { %1709 = vmatmul.msk.bf16.vlgmr.msrb.gmra.mxu3 %vm258_vm1, %v1708_v5  ;;  %v687_v6 = vpop.permute.xlu0 %686  ;;  %1711 = vmatmul.msk.bf16.vlgmr.msra.gmra.mxu1 %vm258_vm1, %v1708_v5  ;;  %v689_v7 = vpop.permute.xlu1 %688 }
  0xc9   : > { %v692_v8 = vsel %vm690_vm6, %v685_v50, %v687_v6  ;;  %v693_v9 = vsel %vm690_vm6, %v687_v6, %v689_v7  ;;  %1453 = vrot.lane.b32.xlu2 %v1445_v38, %s1832_s24  ;;  %v348_v48 = vpop.f32.mrf.mxu0  ;;  %v361_v5 = vpop.f32.mrf.mxu1  ;;  %v1724_v6 = vld [vmem:[%s2203_s3 + $0x10] sm:$0xf] }
  0xca   : > { %v701_v10 = vand.u32 %v692_v8, %v1930_v42  ;;  %v704_v11 = vand.u32 %v693_v9, %v1930_v42  ;;  %v840_v12 = vpop.permute.xlu2 %839  ;;  %v2072_v0 = vadd.f32 %v348_v48, %v291_v41  ;;  %v2089_v9 = vadd.f32 %v361_v5, %v304_v4 }
  0xcc   : > { %726 = vmatpush.bf16.msra.mxu3 %v701_v10  ;;  %739 = vmatpush.bf16.msrb.mxu0 %v704_v11 }
  0xce   : > { %1530 = vrot.lane.b32.xlu0 %v1522_v13, %s1832_s24 }
  0xd0   : > { %v762_v14 = vpop.permute.xlu0 %761  ;;  %v764_v15 = vpop.permute.xlu1 %763 }
  0xd1   : > { %v767_v16 = vsel %vm690_vm6, %v760_v57, %v762_v14  ;;  %v768_v17 = vsel %vm690_vm6, %v762_v14, %v764_v15  ;;  %v769_v18 = vsel %vm690_vm6, %v764_v15, %v766_v2  ;;  %1528 = vrot.lane.b32.xlu2 %v1520_v25, %s1832_s24  ;;  %v350_v60 = vpop.f32.mrf.mxu0  ;;  %v306_v14 = vpop.f32.mrf.mxu2 }
  0xd2   : > { %v774_v19 = vsel %vm262_vm0, %v767_v16, 0  ;;  %v777_v20 = vsel %vm262_vm0, %v768_v17, 0  ;;  %v780_v21 = vsel %vm262_vm0, %v769_v18, 0  ;;  %v915_v22 = vpop.permute.xlu2 %914  ;;  %v363_v15 = vpop.f32.mrf.mxu1 }
  0xd3   : > { %789 = vmatpush.bf16.msrb.mxu1 %v774_v19  ;;  %802 = vmatpush.bf16.msrb.mxu2 %v777_v20 }
  0xd4   : > { %815 = vmatpush.bf16.msrb.mxu3 %v780_v21 }
  0xd7   : > { %1713 = vmatmul.msk.bf16.vlgmr.msra.gmra.mxu2 %vm313_vm3, %v1712_v23  ;;  %1715 = vmatmul.msk.bf16.vlgmr.msrb.gmra.mxu0 %vm313_vm3, %v1712_v23 }
  0xd8   : > { %1714 = vmatmul.msk.bf16.vlgmr.msra.gmra.mxu3 %vm313_vm3, %v1712_v23  ;;  %v836_v26 = vpop.permute.xlu0 %835  ;;  %1717 = vmatmul.msk.bf16.vlgmr.msrb.gmra.mxu1 %vm258_vm1, %v1716_v24  ;;  %v838_v27 = vpop.permute.xlu1 %837  ;;  %v1728_v23 = vld [vmem:[%s2202_s2 + $0x14] sm:$0xf] }
  0xd9   : > { %v844_v28 = vsel %vm843_vm7, %v836_v26, %v838_v27  ;;  %v845_v29 = vsel %vm843_vm7, %v838_v27, %v840_v12 }
  0xda   : > { %v851_v31 = vand.u32 %v844_v28, %v1930_v42  ;;  %v854_v32 = vand.u32 %v845_v29, %v1930_v42  ;;  %v989_v33 = vpop.permute.xlu2 %988 }
  0xdc   : > { %866 = vmatpush.bf16.msra.mxu0 %v851_v31  ;;  %879 = vmatpush.bf16.msra.mxu1 %v854_v32 }
  0xe0   : > { %v842_v34 = vpop.permute.xlu0 %841  ;;  %v913_v35 = vpop.permute.xlu1 %912 }
  0xe1   : > { %v846_v36 = vsel %vm843_vm7, %v840_v12, %v842_v34  ;;  %v920_v37 = vsel %vm843_vm7, %v913_v35, %v915_v22 }
  0xe2   : > { %v857_v38 = vand.u32 %v846_v36, %v1930_v42  ;;  %v927_v39 = vsel %vm262_vm0, %v920_v37, 0  ;;  %v995_v40 = vpop.permute.xlu2 %994 }
  0xe3   : > { %942 = vmatpush.bf16.msra.mxu3 %v927_v39 }
  0xe4   : > { %892 = vmatpush.bf16.msra.mxu2 %v857_v38 }
  0xe7   : > { %1718 = vmatmul.msk.bf16.vlgmr.msrb.gmra.mxu2 %vm258_vm1, %v1716_v24  ;;  %1721 = vmatmul.msk.bf16.vlgmr.msra.gmra.mxu0 %vm313_vm3, %v1720_v43 }
  0xe8   : > { %1719 = vmatmul.msk.bf16.vlgmr.msrb.gmra.mxu3 %vm258_vm1, %v1716_v24  ;;  %1722 = vmatmul.msk.bf16.vlgmr.msra.gmra.mxu1 %vm313_vm3, %v1720_v43  ;;  %v917_v44 = vpop.permute.xlu0 %916  ;;  %v919_v45 = vpop.permute.xlu1 %918  ;;  %v1732_v24 = vld [vmem:[%s2203_s3 + $0x14] sm:$0xf] }
  0xe9   : > { %v921_v46 = vsel %vm843_vm7, %v915_v22, %v917_v44  ;;  %v922_v47 = vsel %vm843_vm7, %v917_v44, %v919_v45 }
  0xea   : > { %v930_v49 = vsel %vm262_vm0, %v921_v46, 0  ;;  %v933_v50 = vsel %vm262_vm0, %v922_v47, 0  ;;  %v1070_v51 = vpop.permute.xlu2 %1069 }
  0xeb   : > { %955 = vmatpush.bf16.msrb.mxu0 %v930_v49  ;;  %968 = vmatpush.bf16.msrb.mxu1 %v933_v50 }
  0xf0   : > { %v993_v55 = vpop.permute.xlu1 %992  ;;  %v991_v56 = vpop.permute.xlu0 %990 }
  0xf1   : > { %v997_v57 = vsel %vm996_vm8, %v989_v33, %v991_v56  ;;  %v998_v58 = vsel %vm996_vm8, %v991_v56, %v993_v55  ;;  %v999_v59 = vsel %vm996_vm8, %v993_v55, %v995_v40  ;;  %v1736_v40 = vld [vmem:[%s2202_s2 + $0x18] sm:$0xf] }
  0xf2   : > { %v1004_v61 = vand.u32 %v997_v57, %v1930_v42  ;;  %v1007_v62 = vand.u32 %v998_v58, %v1930_v42  ;;  %v1010_v63 = vand.u32 %v999_v59, %v1930_v42  ;;  %v1144_v2 = vpop.permute.xlu2 %1143  ;;  %v1740_v59 = vld [vmem:[%s2203_s3 + $0x18] sm:$0xf] }
  0xf4   : > { %1019 = vmatpush.bf16.msrb.mxu2 %v1004_v61  ;;  %1032 = vmatpush.bf16.msrb.mxu3 %v1007_v62 }
  0xf5   : > { %1045 = vmatpush.bf16.msra.mxu0 %v1010_v63 }
  0xf7   : > { %1723 = vmatmul.msk.bf16.vlgmr.msra.gmra.mxu2 %vm313_vm3, %v1720_v43  ;;  %1726 = vmatmul.msk.bf16.vlgmr.msrb.gmra.mxu0 %vm258_vm1, %v1724_v6 }
  0xf8   : > { %1725 = vmatmul.msk.bf16.vlgmr.msra.gmra.mxu3 %vm258_vm1, %v1724_v6  ;;  %1727 = vmatmul.msk.bf16.vlgmr.msrb.gmra.mxu1 %vm258_vm1, %v1724_v6  ;;  %v1068_v7 = vpop.permute.xlu1 %1067  ;;  %v1066_v8 = vpop.permute.xlu0 %1065 }
  0xf9   : > { %v1073_v10 = vsel %vm996_vm8, %v1066_v8, %v1068_v7  ;;  %v1074_v11 = vsel %vm996_vm8, %v1068_v7, %v1070_v51 }
  0xfa   : > { %v1080_v12 = vsel %vm262_vm0, %v1073_v10, 0  ;;  %v1083_v13 = vsel %vm262_vm0, %v1074_v11, 0  ;;  %v1219_v16 = vpop.permute.xlu2 %1218 }
  0xfb   : > { %1095 = vmatpush.bf16.msra.mxu1 %v1080_v12  ;;  %1108 = vmatpush.bf16.msra.mxu2 %v1083_v13 }
 0x100   : > { %v1072_v17 = vpop.permute.xlu0 %1071  ;;  %v1142_v18 = vpop.permute.xlu1 %1141 }
 0x101   : > { %v1075_v19 = vsel %vm996_vm8, %v1070_v51, %v1072_v17  ;;  %v1150_v20 = vsel %vm1149_vm9, %v1142_v18, %v1144_v2 }
 0x102   : > { %v1086_v21 = vsel %vm262_vm0, %v1075_v19, 0  ;;  %v1157_v22 = vand.u32 %v1150_v20, %v1930_v42  ;;  %v1225_v25 = vpop.permute.xlu2 %1224 }
 0x103   : > { %1121 = vmatpush.bf16.msra.mxu3 %v1086_v21 }
 0x104   : > { %1172 = vmatpush.bf16.msrb.mxu0 %v1157_v22 }
 0x107   : > { %1729 = vmatmul.msk.bf16.vlgmr.msrb.gmra.mxu2 %vm313_vm3, %v1728_v23  ;;  %1731 = vmatmul.msk.bf16.vlgmr.msra.gmra.mxu0 %vm313_vm3, %v1728_v23 }
 0x108   : > { %1730 = vmatmul.msk.bf16.vlgmr.msrb.gmra.mxu3 %vm313_vm3, %v1728_v23  ;;  %1733 = vmatmul.msk.bf16.vlgmr.msra.gmra.mxu1 %vm258_vm1, %v1732_v24  ;;  %v1146_v26 = vpop.permute.xlu0 %1145  ;;  %v1148_v27 = vpop.permute.xlu1 %1147 }
 0x109   : > { %v1151_v28 = vsel %vm1149_vm9, %v1144_v2, %v1146_v26  ;;  %v1152_v29 = vsel %vm1149_vm9, %v1146_v26, %v1148_v27 }
 0x10a   : > { %v1160_v30 = vand.u32 %v1151_v28, %v1930_v42  ;;  %v1163_v31 = vand.u32 %v1152_v29, %v1930_v42  ;;  %v1299_v39 = vpop.permute.xlu2 %1298 }
 0x10c   : > { %1185 = vmatpush.bf16.msrb.mxu1 %v1160_v30  ;;  %1198 = vmatpush.bf16.msrb.mxu2 %v1163_v31 }
 0x110   : > { %v1221_v32 = vpop.permute.xlu0 %1220  ;;  %v1223_v33 = vpop.permute.xlu1 %1222 }
 0x111   : > { %v1226_v34 = vsel %vm1149_vm9, %v1219_v16, %v1221_v32  ;;  %v1227_v35 = vsel %vm1149_vm9, %v1221_v32, %v1223_v33  ;;  %v1228_v36 = vsel %vm1149_vm9, %v1223_v33, %v1225_v25 }
 0x112   : > { %v1233_v37 = vsel %vm262_vm0, %v1226_v34, 0  ;;  %v1236_v1 = vsel %vm262_vm0, %v1227_v35, 0  ;;  %v1239_v38 = vsel %vm262_vm0, %v1228_v36, 0 }
 0x113   : > { %1248 = vmatpush.bf16.msrb.mxu3 %v1233_v37  ;;  %1261 = vmatpush.bf16.msra.mxu0 %v1236_v1  ;;  %v1374_v49 = vpop.permute.xlu2 %1373 }
 0x114   : > { %1274 = vmatpush.bf16.msra.mxu1 %v1239_v38 }
 0x115   : > { %v485_v41 = vpop.f32.mrf.mxu1 }
 0x117   : > { %1734 = vmatmul.msk.bf16.vlgmr.msra.gmra.mxu2 %vm258_vm1, %v1732_v24  ;;  %1737 = vmatmul.msk.bf16.vlgmr.msrb.gmra.mxu0 %vm313_vm3, %v1736_v40 }
 0x118   : > { %1735 = vmatmul.msk.bf16.vlgmr.msra.gmra.mxu3 %vm258_vm1, %v1732_v24  ;;  %1738 = vmatmul.msk.bf16.vlgmr.msrb.gmra.mxu1 %vm313_vm3, %v1736_v40  ;;  %v1295_v43 = vpop.permute.xlu0 %1294  ;;  %v1297_v44 = vpop.permute.xlu1 %1296  ;;  %v1748_v24 = vld [vmem:[%s2203_s3 + $0x1c] sm:$0xf] }
 0x119   : > { %v1303_v45 = vsel %vm1302_vm10, %v1295_v43, %v1297_v44  ;;  %v1304_v46 = vsel %vm1302_vm10, %v1297_v44, %v1299_v39 }
 0x11a   : > { %v1310_v47 = vand.u32 %v1303_v45, %v1930_v42  ;;  %v1313_v48 = vand.u32 %v1304_v46, %v1930_v42  ;;  %v1752_v45 = vld [vmem:[%s2202_s2 + $0x20] sm:$0xf]  ;;  %v1833_v46 = vmov 0  }
 0x11b   : > { %v1448_v60 = vpop.permute.xlu2 %1447  ;;  %1798 = vset.pattern.permute.xlu1 %v1833_v46  ;;  %1799 = vset.pattern.permute.xlu0 %v1833_v46 }
 0x11c   : > { %1325 = vmatpush.bf16.msra.mxu2 %v1310_v47  ;;  %1338 = vmatpush.bf16.msra.mxu3 %v1313_v48  ;;  %v1589_v47 = vld [vmem:[%s2204_s4] sm:$0xff] }
 0x11d   : > { %v487_v50 = vpop.f32.mrf.mxu1  ;;  %1592 = vperm.xlu1 %1798, %v1589_v47  }
 0x120   : > { %v1301_v51 = vpop.permute.xlu0 %1300  ;;  %v1372_v52 = vpop.permute.xlu1 %1371 }
 0x121   : > { %v1305_v53 = vsel %vm1302_vm10, %v1299_v39, %v1301_v51  ;;  %v1379_v55 = vsel %vm1302_vm10, %v1372_v52, %v1374_v49 }
 0x122   : > { %v1316_v56 = vand.u32 %v1305_v53, %v1930_v42  ;;  %v1386_v57 = vsel %vm262_vm0, %v1379_v55, 0 }
 0x123   : > { %1401 = vmatpush.bf16.msrb.mxu1 %v1386_v57  ;;  %v1454_v12 = vpop.permute.xlu2 %1453 }
 0x124   : > { %v435_v58 = vpop.f32.mrf.mxu0  ;;  %1351 = vmatpush.bf16.msrb.mxu0 %v1316_v56 }
 0x125   : > { %v441_v61 = vadd.f32 %v435_v58, %v2089_v9 }
 0x127   : > { %1739 = vmatmul.msk.bf16.vlgmr.msrb.gmra.mxu2 %vm313_vm3, %v1736_v40  ;;  %1742 = vmatmul.msk.bf16.vlgmr.msra.gmra.mxu0 %vm258_vm1, %v1740_v59 }
 0x128   : > { %1741 = vmatmul.msk.bf16.vlgmr.msrb.gmra.mxu3 %vm258_vm1, %v1740_v59  ;;  %1743 = vmatmul.msk.bf16.vlgmr.msra.gmra.mxu1 %vm258_vm1, %v1740_v59  ;;  %v1376_v62 = vpop.permute.xlu0 %1375  ;;  %v1378_v63 = vpop.permute.xlu1 %1377 }
 0x129   : > { %v1380_v2 = vsel %vm1302_vm10, %v1374_v49, %v1376_v62  ;;  %v1381_v3 = vsel %vm1302_vm10, %v1376_v62, %v1378_v63 }
 0x12a   : > { %v409_v4 = vpop.f32.mrf.mxu2  ;;  %v1389_v5 = vsel %vm262_vm0, %v1380_v2, 0  ;;  %v1392_v6 = vsel %vm262_vm0, %v1381_v3, 0 }
 0x12b   : > { %v439_v7 = vadd.f32 %v409_v4, %v2074_v54  ;;  %v422_v8 = vpop.f32.mrf.mxu3  ;;  %1414 = vmatpush.bf16.msrb.mxu2 %v1389_v5  ;;  %1427 = vmatpush.bf16.msrb.mxu3 %v1392_v6  ;;  %v1529_v26 = vpop.permute.xlu2 %1528 }
 0x12c   : > { %v440_v9 = vadd.f32 %v422_v8, %v2072_v0  ;;  %v437_v10 = vpop.f32.mrf.mxu0  ;;  %v1744_v0 = vld [vmem:[%s2202_s2 + $0x1c] sm:$0xf] }
 0x12d   : > { %v515_v11 = vadd.f32 %v485_v41, %v439_v7 }
 0x130   : > { %v1450_v13 = vpop.permute.xlu0 %1449  ;;  %v1452_v14 = vpop.permute.xlu1 %1451 }
 0x131   : > { %v1456_v15 = vsel %vm1455_vm11, %v1448_v60, %v1450_v13  ;;  %v1457_v16 = vsel %vm1455_vm11, %v1450_v13, %v1452_v14  ;;  %v1458_v19 = vsel %vm1455_vm11, %v1452_v14, %v1454_v12 }
 0x132   : > { %v411_v17 = vpop.f32.mrf.mxu2  ;;  %v1463_v18 = vand.u32 %v1456_v15, %v1930_v42  ;;  %v1466_v54 = vand.u32 %v1457_v16, %v1930_v42  ;;  %v1469_v25 = vand.u32 %v1458_v19, %v1930_v42 }
 0x133   : > { %v424_v20 = vpop.f32.mrf.mxu3 }
 0x134   : > { %v562_v21 = vpop.f32.mrf.mxu0  ;;  %1478 = vmatpush.bf16.msra.mxu0 %v1463_v18  ;;  %1491 = vmatpush.bf16.msra.mxu1 %v1466_v54 }
 0x135   : > { %v592_v22 = vadd.f32 %v562_v21, %v515_v11  ;;  %v575_v23 = vpop.f32.mrf.mxu1 }
 0x137   : > { %1745 = vmatmul.msk.bf16.vlgmr.msra.gmra.mxu2 %vm313_vm3, %v1744_v0  ;;  %1747 = vmatmul.msk.bf16.vlgmr.msrb.gmra.mxu0 %vm313_vm3, %v1744_v0 }
 0x138   : > { %1746 = vmatmul.msk.bf16.vlgmr.msra.gmra.mxu3 %vm313_vm3, %v1744_v0  ;;  %1749 = vmatmul.msk.bf16.vlgmr.msrb.gmra.mxu1 %vm258_vm1, %v1748_v24  ;;  %v1527_v27 = vpop.permute.xlu1 %1526  ;;  %v1525_v28 = vpop.permute.xlu0 %1524 }
 0x139   : > { %1504 = vmatpush.bf16.msra.mxu2 %v1469_v25  ;;  %v1532_v29 = vsel %vm1455_vm11, %v1525_v28, %v1527_v27  ;;  %v1533_v30 = vsel %vm1455_vm11, %v1527_v27, %v1529_v26 }
 0x13a   : > { %v498_v31 = vpop.f32.mrf.mxu2  ;;  %v1539_v32 = vsel %vm262_vm0, %v1532_v29, 0  ;;  %v1542_v42 = vsel %vm262_vm0, %v1533_v30, 0 }
 0x13b   : > { %v516_v33 = vadd.f32 %v498_v31, %v440_v9  ;;  %v511_v34 = vpop.f32.mrf.mxu3  ;;  %1554 = vmatpush.bf16.msra.mxu3 %v1539_v32  ;;  %1567 = vmatpush.bf16.msrb.mxu0 %v1542_v42 }
 0x13c   : > { %v517_v35 = vadd.f32 %v511_v34, %v441_v61  ;;  %v564_v36 = vpop.f32.mrf.mxu0  ;;  %v1756_v61 = vld [vmem:[%s2203_s3 + $0x20] sm:$0xf] }
 0x13d   : > { %v593_v37 = vadd.f32 %v575_v23, %v516_v33  ;;  %v577_v1 = vpop.f32.mrf.mxu1 }
 0x140   : > { %v1531_v38 = vpop.permute.xlu0 %1530 }
 0x141   : > { %v1534_v39 = vsel %vm1455_vm11, %v1529_v26, %v1531_v38 }
 0x142   : > { %v500_v40 = vpop.f32.mrf.mxu2  ;;  %v1545_v41 = vsel %vm262_vm0, %v1534_v39, 0 }
 0x143   : > { %v513_v43 = vpop.f32.mrf.mxu3  ;;  %1580 = vmatpush.bf16.msrb.mxu1 %v1545_v41 }
 0x144   : > { %v651_v44 = vpop.f32.mrf.mxu0 }
 0x145   : > { %v669_v48 = vadd.f32 %v651_v44, %v593_v37  ;;  %v664_v49 = vpop.f32.mrf.mxu1 }
 0x147   : > { %1750 = vmatmul.msk.bf16.vlgmr.msrb.gmra.mxu2 %vm258_vm1, %v1748_v24  ;;  %1753 = vmatmul.msk.bf16.vlgmr.msra.gmra.mxu0 %vm313_vm3, %v1752_v45 }
 0x148   : > { %1751 = vmatmul.msk.bf16.vlgmr.msrb.gmra.mxu3 %vm258_vm1, %v1748_v24  ;;  %1754 = vmatmul.msk.bf16.vlgmr.msra.gmra.mxu1 %vm313_vm3, %v1752_v45 }
 0x14a   : > { %v588_v50 = vpop.f32.mrf.mxu2 }
 0x14b   : > { %v594_v51 = vadd.f32 %v588_v50, %v517_v35  ;;  %v638_v52 = vpop.f32.mrf.mxu3 }
 0x14c   : > { %v668_v53 = vadd.f32 %v638_v52, %v592_v22  ;;  %v653_v55 = vpop.f32.mrf.mxu0 }
 0x14d   : > { %v670_v56 = vadd.f32 %v664_v49, %v594_v51  ;;  %v666_v57 = vpop.f32.mrf.mxu1 }
 0x152   : > { %v590_v58 = vpop.f32.mrf.mxu2 }
 0x153   : > { %v640_v59 = vpop.f32.mrf.mxu3 }
 0x154   : > { %v741_v60 = vpop.f32.mrf.mxu0 }
 0x155   : > { %v747_v62 = vadd.f32 %v741_v60, %v670_v56  ;;  %v791_v63 = vpop.f32.mrf.mxu1 }
 0x157   : > { %1755 = vmatmul.msk.bf16.vlgmr.msra.gmra.mxu2 %vm313_vm3, %v1752_v45  ;;  %1758 = vmatmul.msk.bf16.vlgmr.msrb.gmra.mxu0 %vm258_vm1, %v1756_v61 }
 0x158   : > { %1757 = vmatmul.msk.bf16.vlgmr.msra.gmra.mxu3 %vm258_vm1, %v1756_v61  ;;  %1759 = vmatmul.msk.bf16.vlgmr.msrb.gmra.mxu1 %vm258_vm1, %v1756_v61 }
 0x15a   : > { %v715_v2 = vpop.f32.mrf.mxu2 }
 0x15b   : > { %v745_v3 = vadd.f32 %v715_v2, %v668_v53  ;;  %v728_v4 = vpop.f32.mrf.mxu3 }
 0x15c   : > { %v746_v5 = vadd.f32 %v728_v4, %v669_v48  ;;  %v743_v6 = vpop.f32.mrf.mxu0 }
 0x15d   : > { %v821_v7 = vadd.f32 %v791_v63, %v745_v3  ;;  %v793_v8 = vpop.f32.mrf.mxu1 }
 0x162   : > { %v717_v9 = vpop.f32.mrf.mxu2 }
 0x163   : > { %v730_v10 = vpop.f32.mrf.mxu3 }
 0x164   : > { %v868_v11 = vpop.f32.mrf.mxu0 }
 0x165   : > { %v898_v12 = vadd.f32 %v868_v11, %v821_v7  ;;  %v881_v13 = vpop.f32.mrf.mxu1 }
 0x16a   : > { %v804_v14 = vpop.f32.mrf.mxu2 }
 0x16b   : > { %v822_v15 = vadd.f32 %v804_v14, %v746_v5  ;;  %v817_v16 = vpop.f32.mrf.mxu3 }
 0x16c   : > { %v823_v17 = vadd.f32 %v817_v16, %v747_v62  ;;  %v870_v18 = vpop.f32.mrf.mxu0 }
 0x16d   : > { %v899_v54 = vadd.f32 %v881_v13, %v822_v15  ;;  %v883_v19 = vpop.f32.mrf.mxu1 }
 0x172   : > { %v806_v20 = vpop.f32.mrf.mxu2 }
 0x173   : > { %v819_v21 = vpop.f32.mrf.mxu3 }
 0x174   : > { %v957_v0 = vpop.f32.mrf.mxu0 }
 0x175   : > { %v975_v22 = vadd.f32 %v957_v0, %v899_v54  ;;  %v970_v23 = vpop.f32.mrf.mxu1 }
 0x17a   : > { %v894_v24 = vpop.f32.mrf.mxu2 }
 0x17b   : > { %v900_v25 = vadd.f32 %v894_v24, %v823_v17  ;;  %v944_v26 = vpop.f32.mrf.mxu3 }
 0x17c   : > { %v974_v27 = vadd.f32 %v944_v26, %v898_v12  ;;  %v959_v28 = vpop.f32.mrf.mxu0 }
 0x17d   : > { %v976_v29 = vadd.f32 %v970_v23, %v900_v25  ;;  %v972_v30 = vpop.f32.mrf.mxu1 }
 0x182   : > { %v896_v31 = vpop.f32.mrf.mxu2 }
 0x183   : > { %v946_v32 = vpop.f32.mrf.mxu3 }
 0x184   : > { %v1047_v42 = vpop.f32.mrf.mxu0 }
 0x185   : > { %v1053_v33 = vadd.f32 %v1047_v42, %v976_v29  ;;  %v1097_v34 = vpop.f32.mrf.mxu1 }
 0x18a   : > { %v1021_v35 = vpop.f32.mrf.mxu2 }
 0x18b   : > { %v1051_v36 = vadd.f32 %v1021_v35, %v974_v27  ;;  %v1034_v37 = vpop.f32.mrf.mxu3 }
 0x18c   : > { %v1049_v1 = vpop.f32.mrf.mxu0  ;;  %v1052_v5 = vadd.f32 %v1034_v37, %v975_v22 }
 0x18d   : > { %v1127_v38 = vadd.f32 %v1097_v34, %v1051_v36  ;;  %v1099_v39 = vpop.f32.mrf.mxu1 }
 0x18f   : > { %v1593_v25 = vpop.permute.xlu1 %1592 }
 0x192   : > { %v1023_v40 = vpop.f32.mrf.mxu2 }
 0x193   : > { %v1036_v41 = vpop.f32.mrf.mxu3 }
 0x194   : > { %v1174_v43 = vpop.f32.mrf.mxu0 }
 0x195   : > { %v1187_v44 = vpop.f32.mrf.mxu1  ;;  %v1204_v54 = vadd.f32 %v1174_v43, %v1127_v38 }
 0x19a   : > { %v1110_v45 = vpop.f32.mrf.mxu2 }
 0x19b   : > { %v1123_v46 = vpop.f32.mrf.mxu3  ;;  %v1128_v8 = vadd.f32 %v1110_v45, %v1052_v5 }
 0x19c   : > { %v1176_v47 = vpop.f32.mrf.mxu0  ;;  %v1129_v17 = vadd.f32 %v1123_v46, %v1053_v33 }
 0x19d   : > { %v1189_v48 = vpop.f32.mrf.mxu1  ;;  %v1205_v10 = vadd.f32 %v1187_v44, %v1128_v8 }
 0x1a2   : > { %v1112_v49 = vpop.f32.mrf.mxu2 }
 0x1a3   : > { %v1125_v50 = vpop.f32.mrf.mxu3 }
 0x1a4   : > { %v1263_v51 = vpop.f32.mrf.mxu0 }
 0x1a5   : > { %v1276_v52 = vpop.f32.mrf.mxu1  ;;  %v1281_v12 = vadd.f32 %v1263_v51, %v1205_v10 }
 0x1aa   : > { %v1200_v53 = vpop.f32.mrf.mxu2 }
 0x1ab   : > { %v1250_v55 = vpop.f32.mrf.mxu3  ;;  %v1206_v19 = vadd.f32 %v1200_v53, %v1129_v17 }
 0x1ac   : > { %v1265_v56 = vpop.f32.mrf.mxu0  ;;  %v1280_v20 = vadd.f32 %v1250_v55, %v1204_v54 }
 0x1ad   : > { %v1278_v57 = vpop.f32.mrf.mxu1  ;;  %v1282_v26 = vadd.f32 %v1276_v52, %v1206_v19 }
 0x1b2   : > { %v1202_v58 = vpop.f32.mrf.mxu2 }
 0x1b3   : > { %v1252_v59 = vpop.f32.mrf.mxu3 }
 0x1b4   : > { %v1353_v60 = vpop.f32.mrf.mxu0 }
 0x1b5   : > { %v1403_v61 = vpop.f32.mrf.mxu1  ;;  %v1359_v29 = vadd.f32 %v1353_v60, %v1282_v26 }
 0x1ba   : > { %v1327_v62 = vpop.f32.mrf.mxu2 }
 0x1bb   : > { %v1340_v63 = vpop.f32.mrf.mxu3  ;;  %v1357_v23 = vadd.f32 %v1327_v62, %v1280_v20 }
 0x1bc   : > { %v1355_v2 = vpop.f32.mrf.mxu0  ;;  %v1358_v15 = vadd.f32 %v1340_v63, %v1281_v12 }
 0x1bd   : > { %v1405_v3 = vpop.f32.mrf.mxu1  ;;  %v1433_v31 = vadd.f32 %v1403_v61, %v1357_v23 }
 0x1c2   : > { %v1329_v4 = vpop.f32.mrf.mxu2 }
 0x1c3   : > { %v1342_v6 = vpop.f32.mrf.mxu3 }
 0x1c4   : > { %v1480_v7 = vpop.f32.mrf.mxu0 }
 0x1c5   : > { %v1493_v9 = vpop.f32.mrf.mxu1  ;;  %v1510_v42 = vadd.f32 %v1480_v7, %v1433_v31 }
 0x1ca   : > { %v1416_v11 = vpop.f32.mrf.mxu2 }
 0x1cb   : > { %v1429_v13 = vpop.f32.mrf.mxu3  ;;  %v1434_v18 = vadd.f32 %v1416_v11, %v1358_v15 }
 0x1cc   : > { %v1482_v14 = vpop.f32.mrf.mxu0  ;;  %v1435_v32 = vadd.f32 %v1429_v13, %v1359_v29 }
 0x1cd   : > { %v1495_v16 = vpop.f32.mrf.mxu1  ;;  %v1511_v0 = vadd.f32 %v1493_v9, %v1434_v18 }
 0x1d2   : > { %v1418_v21 = vpop.f32.mrf.mxu2 }
 0x1d3   : > { %v1431_v22 = vpop.f32.mrf.mxu3 }
 0x1d4   : > { %v1569_v24 = vpop.f32.mrf.mxu0 }
 0x1d5   : > { %v1587_v27 = vadd.f32 %v1569_v24, %v1511_v0  ;;  %v1582_v28 = vpop.f32.mrf.mxu1 }
 0x1d7   : > { %v1596_v30 = vadd.f32 %v1593_v25, %v1587_v27 }
 0x1d9   : > { %1599 = vst [vmem:[%s246_s10 + $0x8] sm:$0xff] %v1596_v30 }
 0x1da   : > { %v1506_v33 = vpop.f32.mrf.mxu2 }
 0x1db   : > { %v1512_v34 = vadd.f32 %v1506_v33, %v1435_v32  ;;  %v1556_v35 = vpop.f32.mrf.mxu3 }
 0x1dc   : > { %v1586_v36 = vadd.f32 %v1556_v35, %v1510_v42  ;;  %v1571_v37 = vpop.f32.mrf.mxu0 }
 0x1dd   : > { %v1588_v1 = vadd.f32 %v1582_v28, %v1512_v34  ;;  %v1584_v38 = vpop.f32.mrf.mxu1 }
 0x1de   : > { %v1595_v39 = vadd.f32 %v1593_v25, %v1586_v36 }
 0x1df   : > { %v1597_v40 = vadd.f32 %v1593_v25, %v1588_v1 }
 0x1e0   : > { %1598 = vst [vmem:[%s246_s10] sm:$0xff] %v1595_v39 }
 0x1e1   : > { %1600 = vst [vmem:[%s246_s10 + $0x10] sm:$0xff] %v1597_v40 }
 0x1e2   : > { %v1508_v41 = vpop.f32.mrf.mxu2 }
 0x1e3   : > { %v1558_v43 = vpop.f32.mrf.mxu3 }
 0x1e4 PF: > { %s15_s20 = sadd.s32 1, %s1822_s20   ;;  %s2206_s18 = smov %s1818_s19 }
 0x1e5   : > { %p12_p5 = scmp.ge.s32.totalorder %s15_s20, 4   ;;  %s2207_s19 = smov %s2209_s21 }
 0x1e7   :  { %14 = sbr.rel (!%p12_p5) target bundleno = 2 (0x2), region = 86 }

</bundles_post_ra>
